<compile_context>
chip_gen: v5e
topology: v5e:2x2
jax: 0.10.0
libtpu: 0.0.40
codegen_flags: <defaults>
</compile_context>

<pallas_src>
import functools

import jax
import jax.numpy as jnp
from jax.experimental import pallas as pl
from jax.experimental.pallas import tpu as pltpu

NUM_CLASSES = 10
LANE = 128
SUBLANE = 8


def _ensemble_kernel(x_ref, w_ref, b_ref, o_ref, *, num_models, ncls_pad):
    # One fused MXU matmul over all ensemble members:
    #   (TILE_B, D) @ (D, M * NCLS_PAD) -> (TILE_B, M * NCLS_PAD)
    y = jnp.dot(x_ref[...], w_ref[...], preferred_element_type=jnp.float32)

    # Reduce over ensemble members; each slice is a lane-tile (128) aligned
    # window, so this lowers to plain vector adds (no cross-lane work).
    acc = y[:, :ncls_pad]
    for m in range(1, num_models):
        acc = acc + y[:, m * ncls_pad:(m + 1) * ncls_pad]

    # Bias was pre-summed over members in the wrapper; 1/M is a compile-time
    # constant.  Output block is lane-dense (NCLS_PAD = 128).
    o_ref[...] = ((acc + b_ref[...]) * (1.0 / num_models)).astype(o_ref.dtype)


def fusion_ensemble_forward(x_nchw, weights, biases, *, tile_b=128):
    """Fused ensemble forward.

    x_nchw:  (B, C, H, W) float32
    weights: (M, D, NUM_CLASSES) float32, D = C*H*W
    biases:  (M, 1, NUM_CLASSES) float32
    returns: (B, NUM_CLASSES) float32  ==  (sum_m x@W_m + b_m) / M
    """
    B, C, H, W = x_nchw.shape
    D = C * H * W
    M, _, ncls = weights.shape

    # Lane-dense class dimension.
    ncls_pad = ((ncls + LANE - 1) // LANE) * LANE

    # Flatten exactly like torch.flatten(x, 1) (row-major over C, H, W).
    x_flat = x_nchw.reshape(B, D).astype(jnp.float32)

    # Sublane-dense batch tile; grid axis over batch (parallel -> megacore).
    b_min = ((B + SUBLANE - 1) // SUBLANE) * SUBLANE
    tb = min(tile_b, max(SUBLANE, b_min))
    b_pad = ((B + tb - 1) // tb) * tb
    x_pad = jnp.zeros((b_pad, D), jnp.float32).at[:B].set(x_flat)

    # Fold the ensemble axis into the matmul N dimension, lane-padded per
    # member:  (M, D, ncls) -> (D, M * ncls_pad).
    w_pad = jnp.zeros((M, D, ncls_pad), jnp.float32).at[:, :, :ncls].set(
        weights.astype(jnp.float32))
    w_folded = jnp.transpose(w_pad, (1, 0, 2)).reshape(D, M * ncls_pad)

    # Hoist the bias out of the per-member work: sum over members once.
    b_sum = jnp.zeros((1, ncls_pad), jnp.float32).at[:, :ncls].set(
        jnp.sum(biases[:, 0, :].astype(jnp.float32), axis=0)[None, :])

    kernel = functools.partial(
        _ensemble_kernel, num_models=M, ncls_pad=ncls_pad)

    out_pad = pl.pallas_call(
        kernel,
        out_shape=jax.ShapeDtypeStruct((b_pad, ncls_pad), jnp.float32),
        grid=(b_pad // tb,),
        in_specs=[
            # Per-grid-step batch tile of the input.
            pl.BlockSpec((tb, D), lambda i: (i, 0)),
            # Full folded weight slab, resident across batch tiles.
            pl.BlockSpec((D, M * ncls_pad), lambda i: (0, 0)),
            # Pre-summed bias row (lane-dense).
            pl.BlockSpec((1, ncls_pad), lambda i: (0, 0)),
        ],
        out_specs=pl.BlockSpec((tb, ncls_pad), lambda i: (i, 0)),
        compiler_params=pltpu.CompilerParams(
            dimension_semantics=("parallel",),  # batch tiles are independent
        ),
    )(x_pad, w_folded, b_sum)

    # Strip batch / class padding.
    return out_pad[:B, :ncls]


def _reference(x_nchw, weights, biases):
    B = x_nchw.shape[0]
    x_flat = x_nchw.reshape(B, -1)
    M = weights.shape[0]
    acc = None
    for m in range(M):
        logits = x_flat @ weights[m] + biases[m, 0]
        acc = logits if acc is None else acc + logits
    return acc / M


if __name__ == "__main__":
    # Small shapes consistent with a CIFAR-style NCHW input.
    B, C, H, W = 2, 4, 16, 16
    M = 3  # number of ensemble members
    D = C * H * W

    key = jax.random.PRNGKey(0)
    kx, kw, kb = jax.random.split(key, 3)
    x = jax.random.normal(kx, (B, C, H, W), dtype=jnp.float32)
    # Deterministic synthetic parameters for each ensemble member.
    weights = jax.random.normal(kw, (M, D, NUM_CLASSES), dtype=jnp.float32) * 0.02
    biases = jax.random.normal(kb, (M, 1, NUM_CLASSES), dtype=jnp.float32) * 0.1

    out = fusion_ensemble_forward(x, weights, biases)
    out = jax.block_until_ready(out)

    ref = _reference(x, weights, biases)
    assert out.shape == (B, NUM_CLASSES)
    assert jnp.allclose(out, ref, atol=1e-4, rtol=1e-4), "mismatch vs reference"

    # TODO(synk): the real ensemble wraps pretrained ResNet/WRN/robustbench
    # backbones; they are replaced here by synthetic per-model linear heads.
    print("KERNEL_OK")
</pallas_src>

<mosaic_0001>
module attributes {stable_mosaic.version = 11 : i64} {
  func.func @_ensemble_kernel(%arg0: i32, %arg1: memref<8x1024xf32, #tpu.memory_space<vmem>>, %arg2: memref<1024x384xf32, #tpu.memory_space<vmem>>, %arg3: memref<1x128xf32, #tpu.memory_space<vmem>>, %arg4: memref<8x128xf32, #tpu.memory_space<vmem>>) attributes {dimension_semantics = [#tpu.dimension_semantics<parallel>], iteration_bounds = array<i64: 1>, scalar_prefetch = 0 : i64, scratch_operands = 0 : i64, tpu.core_type = #tpu.core_type<tc>, window_params = [{transform_indices = @transform_0, window_bounds = array<i64: 8, 1024>}, {pipeline_mode = #tpu.pipeline_mode<synchronous>, transform_indices = @transform_1, window_bounds = array<i64: 1024, 384>}, {pipeline_mode = #tpu.pipeline_mode<synchronous>, transform_indices = @transform_2, window_bounds = array<i64: 1, 128>}, {transform_indices = @transform_3, window_bounds = array<i64: 8, 128>}]} {
    %c0 = arith.constant 0 : index
    %c0_0 = arith.constant 0 : index
    %0 = vector.load %arg1[%c0, %c0_0] : memref<8x1024xf32, #tpu.memory_space<vmem>>, vector<8x1024xf32>
    %c0_1 = arith.constant 0 : index
    %c0_2 = arith.constant 0 : index
    %1 = vector.load %arg2[%c0_1, %c0_2] : memref<1024x384xf32, #tpu.memory_space<vmem>>, vector<1024x384xf32>
    %cst = arith.constant dense<0.000000e+00> : vector<8x384xf32>
    %2 = tpu.matmul %0, %1, %cst {dimension_numbers = #tpu.dot_dimension_numbers<[1], [0], [0], [1], [0, 0, 1, 1], [], []>} : vector<8x1024xf32>, vector<1024x384xf32>, vector<8x384xf32> -> vector<8x384xf32>
    %3 = vector.extract_strided_slice %2 {offsets = [0, 0], sizes = [8, 128], strides = [1, 1]} : vector<8x384xf32> to vector<8x128xf32>
    %4 = vector.extract_strided_slice %2 {offsets = [0, 128], sizes = [8, 128], strides = [1, 1]} : vector<8x384xf32> to vector<8x128xf32>
    %5 = arith.addf %3, %4 : vector<8x128xf32>
    %6 = vector.extract_strided_slice %2 {offsets = [0, 256], sizes = [8, 128], strides = [1, 1]} : vector<8x384xf32> to vector<8x128xf32>
    %7 = arith.addf %5, %6 : vector<8x128xf32>
    %c0_3 = arith.constant 0 : index
    %c0_4 = arith.constant 0 : index
    %8 = vector.load %arg3[%c0_3, %c0_4] : memref<1x128xf32, #tpu.memory_space<vmem>>, vector<1x128xf32>
    %9 = vector.broadcast %8 : vector<1x128xf32> to vector<8x128xf32>
    %10 = arith.addf %7, %9 : vector<8x128xf32>
    %cst_5 = arith.constant 0.333333343 : f32
    %11 = vector.broadcast %cst_5 : f32 to vector<8x128xf32>
    %12 = arith.mulf %10, %11 : vector<8x128xf32>
    %c0_6 = arith.constant 0 : index
    %c0_7 = arith.constant 0 : index
    %13 = vector.load %arg4[%c0_6, %c0_7] : memref<8x128xf32, #tpu.memory_space<vmem>>, vector<8x128xf32>
    tpu.vector_store %arg4[%c0_6, %c0_7], %12 {strides = array<i32>} : memref<8x128xf32, #tpu.memory_space<vmem>>, vector<8x128xf32>,
    return
  }
  func.func @transform_0(%arg0: i32) -> (i32, i32) {
    %c0_i32 = arith.constant 0 : i32
    %c0_i32_0 = arith.constant 0 : i32
    return %arg0, %c0_i32 : i32, i32
  }
  func.func @transform_1(%arg0: i32) -> (i32, i32) {
    %c0_i32 = arith.constant 0 : i32
    %c0_i32_0 = arith.constant 0 : i32
    %c0_i32_1 = arith.constant 0 : i32
    return %c0_i32, %c0_i32_0 : i32, i32
  }
  func.func @transform_2(%arg0: i32) -> (i32, i32) {
    %c0_i32 = arith.constant 0 : i32
    %c0_i32_0 = arith.constant 0 : i32
    %c0_i32_1 = arith.constant 0 : i32
    return %c0_i32, %c0_i32_0 : i32, i32
  }
  func.func @transform_3(%arg0: i32) -> (i32, i32) {
    %c0_i32 = arith.constant 0 : i32
    %c0_i32_0 = arith.constant 0 : i32
    return %arg0, %c0_i32 : i32, i32
  }
}

</mosaic_0001>

<bundles_post_ra>
// kernel: tpu_custom_call.1
= control target key start
LH: loop header
LB: loop body
LE: loop exit
PB: predicated region body
PF: predicated region fallthrough
CT: control target
= control target key end

     0   :  { %8 = vsyncpa [#allocation3], 0  ;;  %s1144_s0 = inlined_call_operand.hbm [shape: f32[8,1024], index: 0, kind: input, shape index: {}]   ;;  %s1145_s1 = inlined_call_operand.hbm [shape: f32[1024,384], index: 1, kind: input, shape index: {}]   ;;  %s1146_s2 = inlined_call_operand.hbm [shape: f32[1,128], index: 2, kind: input, shape index: {}]   ;;  %s1147_s3 = inlined_call_operand.hbm [shape: f32[8,128], index: 3, kind: output, shape index: {}]  }
   0x1   :  { %9 = vsyncpa [#allocation6], 0  ;;  %s26_s14 = sshll.u32 %s1145_s1, 4  ;;  %s27_s14 = int_to_ptr.hbm [resolvable:$true] %s26_s14 }
   0x2   :  { %10 = vsyncpa [#allocation4], 0  ;;  %s1069_s15 = smov [#allocation5]   ;;  %s16_s19 = sshll.u32 %s1144_s0, 4  ;;  %s17_s19 = int_to_ptr.hbm [resolvable:$true] %s16_s19 }
   0x3   :  { %s28_s16 = sshll.u32 %s1069_s15, 4  ;;  %s1070_s20 = smov 384   ;;  %s29_s16 = int_to_ptr.vmem [resolvable:$true] %s28_s16 }
   0x4   :  { %s1071_s21 = smov 24   ;;  %s1072_s22 = smov [#allocation2]  }
   0x5   :  { %34 = dma.hbm_to_vmem [thread:$0]  %s27_s14, 49152, %s29_s16, [#allocation6], %s1070_s20, %s1070_s20, %s1071_s21  }
   0x6   :  { %s18_s23 = sshll.u32 %s1072_s22, 4  ;;  %s40_s26 = sshll.u32 %s1146_s2, 4  ;;  %s19_s23 = int_to_ptr.vmem [resolvable:$true] %s18_s23  ;;  %s41_s26 = int_to_ptr.hbm [resolvable:$true] %s40_s26 }
   0x7   :  { %21 = dma.hbm_to_vmem [thread:$0]  %s17_s19, 1024, %s19_s23, [#allocation3]  }
   0x8   :  { %s1073_s1 = smov [#allocation7]  }
   0x9   :  { %s42_s27 = sshll.u32 %s1073_s1, 4  ;;  %s43_s27 = int_to_ptr.vmem [resolvable:$true] %s42_s27 }
   0xa   :  { %45 = dma.hbm_to_vmem [thread:$0]  %s41_s26, 16, %s43_s27, [#allocation6]  }
   0xb   :  { %1063 = dma.done.wait [#allocation3], 1024  }
   0xc   :  { %1064 = vsyncadd [#allocation3], 4294966272 }
   0xd   :  { %1065 = dma.done.wait [#allocation6], 49168  }
   0xe   :  { %1066 = vsyncadd [#allocation6], 4294918128  ;;  %v111_v0 = vld [vmem:[#allocation5 + $0x168] sm:$0xff]  ;;  %v108_v2 = vld [vmem:[#allocation5 + $0x150] sm:$0xff]  ;;  %s1074_s0 = smov [#allocation8]   ;;  %s946_s30 = sshll.u32 %s1147_s3, 4  ;;  %s947_s30 = int_to_ptr.hbm [resolvable:$true] %s946_s30 }
   0xf   :  { %v207_v1 = vld [vmem:[#allocation5 + $0x468] sm:$0xff]  ;;  %450 = vmatpush.msra.mxu0 %v111_v0  ;;  %v204_v4 = vld [vmem:[#allocation5 + $0x450] sm:$0xff]  ;;  %v105_v6 = vld [vmem:[#allocation5 + $0x138] sm:$0xff]  ;;  %s944_s2 = sshll.u32 %s1074_s0, 4  ;;  %s945_s2 = int_to_ptr.vmem [resolvable:$true] %s944_s2 }
  0x10   :  { %490 = vmatpush.msra.mxu2 %v207_v1  ;;  %v159_v3 = vld [vmem:[#allocation5 + $0x2e8] sm:$0xff]  ;;  %v156_v7 = vld [vmem:[#allocation5 + $0x2d0] sm:$0xff]  ;;  %v201_v8 = vld [vmem:[#allocation5 + $0x438] sm:$0xff] }
  0x11   :  { %v255_v5 = vld [vmem:[#allocation5 + $0x5e8] sm:$0xff]  ;;  %470 = vmatpush.msra.mxu1 %v159_v3  ;;  %451 = vmatpush.msra.mxu0 %v108_v2  ;;  %v252_v9 = vld [vmem:[#allocation5 + $0x5d0] sm:$0xff]  ;;  %v153_v10 = vld [vmem:[#allocation5 + $0x2b8] sm:$0xff] }
  0x12   :  { %510 = vmatpush.msra.mxu3 %v255_v5  ;;  %491 = vmatpush.msra.mxu2 %v204_v4  ;;  %v102_v11 = vld [vmem:[#allocation5 + $0x120] sm:$0xff]  ;;  %v249_v13 = vld [vmem:[#allocation5 + $0x5b8] sm:$0xff]  ;;  %v99_v16 = vld [vmem:[#allocation5 + $0x108] sm:$0xff] }
  0x13   :  { %471 = vmatpush.msra.mxu1 %v156_v7  ;;  %v198_v12 = vld [vmem:[#allocation5 + $0x420] sm:$0xff]  ;;  %452 = vmatpush.msra.mxu0 %v105_v6  ;;  %v195_v17 = vld [vmem:[#allocation5 + $0x408] sm:$0xff]  ;;  %v96_v20 = vld [vmem:[#allocation5 + $0xf0] sm:$0xff] }
  0x14   :  { %511 = vmatpush.msra.mxu3 %v252_v9  ;;  %492 = vmatpush.msra.mxu2 %v201_v8  ;;  %v150_v14 = vld [vmem:[#allocation5 + $0x2a0] sm:$0xff]  ;;  %v147_v18 = vld [vmem:[#allocation5 + $0x288] sm:$0xff]  ;;  %v192_v21 = vld [vmem:[#allocation5 + $0x3f0] sm:$0xff] }
  0x15   :  { %v246_v15 = vld [vmem:[#allocation5 + $0x5a0] sm:$0xff]  ;;  %472 = vmatpush.msra.mxu1 %v153_v10  ;;  %453 = vmatpush.msra.mxu0 %v102_v11  ;;  %v243_v19 = vld [vmem:[#allocation5 + $0x588] sm:$0xff]  ;;  %v144_v22 = vld [vmem:[#allocation5 + $0x270] sm:$0xff] }
  0x16   :  { %512 = vmatpush.msra.mxu3 %v249_v13  ;;  %493 = vmatpush.msra.mxu2 %v198_v12  ;;  %v240_v23 = vld [vmem:[#allocation5 + $0x570] sm:$0xff]  ;;  %v93_v24 = vld [vmem:[#allocation5 + $0xd8] sm:$0xff]  ;;  %v90_v28 = vld [vmem:[#allocation5 + $0xc0] sm:$0xff] }
  0x17   :  { %473 = vmatpush.msra.mxu1 %v150_v14  ;;  %454 = vmatpush.msra.mxu0 %v99_v16  ;;  %v189_v25 = vld [vmem:[#allocation5 + $0x3d8] sm:$0xff]  ;;  %v186_v29 = vld [vmem:[#allocation5 + $0x3c0] sm:$0xff]  ;;  %v87_v32 = vld [vmem:[#allocation5 + $0xa8] sm:$0xff] }
  0x18   :  { %513 = vmatpush.msra.mxu3 %v246_v15  ;;  %494 = vmatpush.msra.mxu2 %v195_v17  ;;  %v141_v26 = vld [vmem:[#allocation5 + $0x258] sm:$0xff]  ;;  %v138_v30 = vld [vmem:[#allocation5 + $0x240] sm:$0xff]  ;;  %v183_v33 = vld [vmem:[#allocation5 + $0x3a8] sm:$0xff] }
  0x19   :  { %474 = vmatpush.msra.mxu1 %v147_v18  ;;  %455 = vmatpush.msra.mxu0 %v96_v20  ;;  %v237_v27 = vld [vmem:[#allocation5 + $0x558] sm:$0xff]  ;;  %v234_v31 = vld [vmem:[#allocation5 + $0x540] sm:$0xff]  ;;  %v135_v34 = vld [vmem:[#allocation5 + $0x228] sm:$0xff] }
  0x1a   :  { %514 = vmatpush.msra.mxu3 %v243_v19  ;;  %495 = vmatpush.msra.mxu2 %v192_v21  ;;  %v231_v35 = vld [vmem:[#allocation5 + $0x528] sm:$0xff]  ;;  %v84_v36 = vld [vmem:[#allocation5 + $0x90] sm:$0xff]  ;;  %v81_v40 = vld [vmem:[#allocation5 + $0x78] sm:$0xff] }
  0x1b   :  { %475 = vmatpush.msra.mxu1 %v144_v22  ;;  %456 = vmatpush.msra.mxu0 %v93_v24  ;;  %v180_v37 = vld [vmem:[#allocation5 + $0x390] sm:$0xff]  ;;  %v177_v41 = vld [vmem:[#allocation5 + $0x378] sm:$0xff]  ;;  %v78_v44 = vld [vmem:[#allocation5 + $0x60] sm:$0xff] }
  0x1c   :  { %515 = vmatpush.msra.mxu3 %v240_v23  ;;  %496 = vmatpush.msra.mxu2 %v189_v25  ;;  %v132_v38 = vld [vmem:[#allocation5 + $0x210] sm:$0xff]  ;;  %v129_v42 = vld [vmem:[#allocation5 + $0x1f8] sm:$0xff]  ;;  %v174_v45 = vld [vmem:[#allocation5 + $0x360] sm:$0xff] }
  0x1d   :  { %476 = vmatpush.msra.mxu1 %v141_v26  ;;  %457 = vmatpush.msra.mxu0 %v90_v28  ;;  %v228_v39 = vld [vmem:[#allocation5 + $0x510] sm:$0xff]  ;;  %v225_v43 = vld [vmem:[#allocation5 + $0x4f8] sm:$0xff]  ;;  %v126_v46 = vld [vmem:[#allocation5 + $0x1e0] sm:$0xff] }
  0x1e   :  { %516 = vmatpush.msra.mxu3 %v237_v27  ;;  %497 = vmatpush.msra.mxu2 %v186_v29  ;;  %v222_v47 = vld [vmem:[#allocation5 + $0x4e0] sm:$0xff]  ;;  %v75_v48 = vld [vmem:[#allocation5 + $0x48] sm:$0xff]  ;;  %v72_v52 = vld [vmem:[#allocation5 + $0x30] sm:$0xff] }
  0x1f   :  { %477 = vmatpush.msra.mxu1 %v138_v30  ;;  %458 = vmatpush.msra.mxu0 %v87_v32  ;;  %v171_v49 = vld [vmem:[#allocation5 + $0x348] sm:$0xff]  ;;  %v168_v53 = vld [vmem:[#allocation5 + $0x330] sm:$0xff]  ;;  %v69_v56 = vld [vmem:[#allocation5 + $0x18] sm:$0xff] }
  0x20   :  { %517 = vmatpush.msra.mxu3 %v234_v31  ;;  %498 = vmatpush.msra.mxu2 %v183_v33  ;;  %v123_v50 = vld [vmem:[#allocation5 + $0x1c8] sm:$0xff]  ;;  %v120_v54 = vld [vmem:[#allocation5 + $0x1b0] sm:$0xff]  ;;  %v165_v57 = vld [vmem:[#allocation5 + $0x318] sm:$0xff] }
  0x21   :  { %478 = vmatpush.msra.mxu1 %v135_v34  ;;  %459 = vmatpush.msra.mxu0 %v84_v36  ;;  %v219_v51 = vld [vmem:[#allocation5 + $0x4c8] sm:$0xff]  ;;  %v216_v55 = vld [vmem:[#allocation5 + $0x4b0] sm:$0xff]  ;;  %v117_v58 = vld [vmem:[#allocation5 + $0x198] sm:$0xff] }
  0x22   :  { %518 = vmatpush.msra.mxu3 %v231_v35  ;;  %499 = vmatpush.msra.mxu2 %v180_v37  ;;  %v213_v59 = vld [vmem:[#allocation5 + $0x498] sm:$0xff]  ;;  %v66_v60 = vld [vmem:[#allocation5] sm:$0xff]  ;;  %v303_v62 = vld [vmem:[#allocation5 + $0x768] sm:$0xff] }
  0x23   :  { %479 = vmatpush.msra.mxu1 %v132_v38  ;;  %460 = vmatpush.msra.mxu0 %v81_v40  ;;  %v162_v61 = vld [vmem:[#allocation5 + $0x300] sm:$0xff]  ;;  %v399_v63 = vld [vmem:[#allocation5 + $0xa68] sm:$0xff]  ;;  %v300_v2 = vld [vmem:[#allocation5 + $0x750] sm:$0xff] }
  0x24   :  { %519 = vmatpush.msra.mxu3 %v228_v39  ;;  %500 = vmatpush.msra.mxu2 %v177_v41  ;;  %v114_v0 = vld [vmem:[#allocation5 + $0x180] sm:$0xff]  ;;  %v351_v3 = vld [vmem:[#allocation5 + $0x8e8] sm:$0xff]  ;;  %v396_v4 = vld [vmem:[#allocation5 + $0xa50] sm:$0xff] }
  0x25   :  { %480 = vmatpush.msra.mxu1 %v129_v42  ;;  %461 = vmatpush.msra.mxu0 %v78_v44  ;;  %v210_v1 = vld [vmem:[#allocation5 + $0x480] sm:$0xff]  ;;  %v447_v5 = vld [vmem:[#allocation5 + $0xbe8] sm:$0xff]  ;;  %v297_v6 = vld [vmem:[#allocation5 + $0x738] sm:$0xff] }
  0x26   :  { %520 = vmatpush.msra.mxu3 %v225_v43  ;;  %501 = vmatpush.msra.mxu2 %v174_v45  ;;  %v348_v7 = vld [vmem:[#allocation5 + $0x8d0] sm:$0xff]  ;;  %v393_v8 = vld [vmem:[#allocation5 + $0xa38] sm:$0xff]  ;;  %v294_v10 = vld [vmem:[#allocation5 + $0x720] sm:$0xff] }
  0x27   :  { %481 = vmatpush.msra.mxu1 %v126_v46  ;;  %462 = vmatpush.msra.mxu0 %v75_v48  ;;  %v444_v9 = vld [vmem:[#allocation5 + $0xbd0] sm:$0xff]  ;;  %v345_v11 = vld [vmem:[#allocation5 + $0x8b8] sm:$0xff]  ;;  %v390_v12 = vld [vmem:[#allocation5 + $0xa20] sm:$0xff] }
  0x28   :  { %521 = vmatpush.msra.mxu3 %v222_v47  ;;  %502 = vmatpush.msra.mxu2 %v171_v49  ;;  %v441_v13 = vld [vmem:[#allocation5 + $0xbb8] sm:$0xff]  ;;  %v291_v14 = vld [vmem:[#allocation5 + $0x708] sm:$0xff]  ;;  %v342_v15 = vld [vmem:[#allocation5 + $0x8a0] sm:$0xff] }
  0x29   :  { %482 = vmatpush.msra.mxu1 %v123_v50  ;;  %463 = vmatpush.msra.mxu0 %v72_v52  ;;  %v387_v16 = vld [vmem:[#allocation5 + $0xa08] sm:$0xff]  ;;  %v438_v17 = vld [vmem:[#allocation5 + $0xba0] sm:$0xff]  ;;  %v288_v18 = vld [vmem:[#allocation5 + $0x6f0] sm:$0xff] }
  0x2a   :  { %522 = vmatpush.msra.mxu3 %v219_v51  ;;  %503 = vmatpush.msra.mxu2 %v168_v53  ;;  %v339_v19 = vld [vmem:[#allocation5 + $0x888] sm:$0xff]  ;;  %v384_v20 = vld [vmem:[#allocation5 + $0x9f0] sm:$0xff]  ;;  %v285_v22 = vld [vmem:[#allocation5 + $0x6d8] sm:$0xff] }
  0x2b   :  { %483 = vmatpush.msra.mxu1 %v120_v54  ;;  %464 = vmatpush.msra.mxu0 %v69_v56  ;;  %v435_v21 = vld [vmem:[#allocation5 + $0xb88] sm:$0xff]  ;;  %v336_v23 = vld [vmem:[#allocation5 + $0x870] sm:$0xff]  ;;  %v381_v24 = vld [vmem:[#allocation5 + $0x9d8] sm:$0xff] }
  0x2c   :  { %523 = vmatpush.msra.mxu3 %v216_v55  ;;  %504 = vmatpush.msra.mxu2 %v165_v57  ;;  %v432_v25 = vld [vmem:[#allocation5 + $0xb70] sm:$0xff]  ;;  %v282_v26 = vld [vmem:[#allocation5 + $0x6c0] sm:$0xff]  ;;  %v333_v27 = vld [vmem:[#allocation5 + $0x858] sm:$0xff] }
  0x2d   :  { %484 = vmatpush.msra.mxu1 %v117_v58  ;;  %465 = vmatpush.msra.mxu0 %v66_v60  ;;  %v378_v28 = vld [vmem:[#allocation5 + $0x9c0] sm:$0xff]  ;;  %v429_v29 = vld [vmem:[#allocation5 + $0xb58] sm:$0xff]  ;;  %v279_v30 = vld [vmem:[#allocation5 + $0x6a8] sm:$0xff] }
  0x2e   :  { %524 = vmatpush.msra.mxu3 %v213_v59  ;;  %505 = vmatpush.msra.mxu2 %v162_v61  ;;  %v330_v31 = vld [vmem:[#allocation5 + $0x840] sm:$0xff]  ;;  %v375_v32 = vld [vmem:[#allocation5 + $0x9a8] sm:$0xff]  ;;  %v276_v34 = vld [vmem:[#allocation5 + $0x690] sm:$0xff] }
  0x2f   :  { %530 = vmatpush.msrb.mxu0 %v303_v62  ;;  %485 = vmatpush.msra.mxu1 %v114_v0  ;;  %v426_v33 = vld [vmem:[#allocation5 + $0xb40] sm:$0xff]  ;;  %v327_v35 = vld [vmem:[#allocation5 + $0x828] sm:$0xff]  ;;  %v372_v36 = vld [vmem:[#allocation5 + $0x990] sm:$0xff] }
  0x30   :  { %570 = vmatpush.msrb.mxu2 %v399_v63  ;;  %525 = vmatpush.msra.mxu3 %v210_v1  ;;  %v423_v37 = vld [vmem:[#allocation5 + $0xb28] sm:$0xff]  ;;  %v273_v38 = vld [vmem:[#allocation5 + $0x678] sm:$0xff]  ;;  %v324_v39 = vld [vmem:[#allocation5 + $0x810] sm:$0xff] }
  0x31   :  { %531 = vmatpush.msrb.mxu0 %v300_v2  ;;  %550 = vmatpush.msrb.mxu1 %v351_v3  ;;  %v369_v40 = vld [vmem:[#allocation5 + $0x978] sm:$0xff]  ;;  %v420_v41 = vld [vmem:[#allocation5 + $0xb10] sm:$0xff]  ;;  %v270_v42 = vld [vmem:[#allocation5 + $0x660] sm:$0xff] }
  0x32   :  { %571 = vmatpush.msrb.mxu2 %v396_v4  ;;  %590 = vmatpush.msrb.mxu3 %v447_v5  ;;  %v321_v43 = vld [vmem:[#allocation5 + $0x7f8] sm:$0xff]  ;;  %v366_v44 = vld [vmem:[#allocation5 + $0x960] sm:$0xff]  ;;  %v267_v46 = vld [vmem:[#allocation5 + $0x648] sm:$0xff] }
  0x33   :  { %532 = vmatpush.msrb.mxu0 %v297_v6  ;;  %551 = vmatpush.msrb.mxu1 %v348_v7  ;;  %v417_v45 = vld [vmem:[#allocation5 + $0xaf8] sm:$0xff]  ;;  %v318_v47 = vld [vmem:[#allocation5 + $0x7e0] sm:$0xff]  ;;  %v363_v48 = vld [vmem:[#allocation5 + $0x948] sm:$0xff] }
  0x34   :  { %572 = vmatpush.msrb.mxu2 %v393_v8  ;;  %591 = vmatpush.msrb.mxu3 %v444_v9  ;;  %v414_v49 = vld [vmem:[#allocation5 + $0xae0] sm:$0xff]  ;;  %v264_v50 = vld [vmem:[#allocation5 + $0x630] sm:$0xff]  ;;  %v315_v51 = vld [vmem:[#allocation5 + $0x7c8] sm:$0xff] }
  0x35   :  { %533 = vmatpush.msrb.mxu0 %v294_v10  ;;  %552 = vmatpush.msrb.mxu1 %v345_v11  ;;  %v360_v52 = vld [vmem:[#allocation5 + $0x930] sm:$0xff]  ;;  %v411_v53 = vld [vmem:[#allocation5 + $0xac8] sm:$0xff]  ;;  %v261_v54 = vld [vmem:[#allocation5 + $0x618] sm:$0xff] }
  0x36   :  { %573 = vmatpush.msrb.mxu2 %v390_v12  ;;  %592 = vmatpush.msrb.mxu3 %v441_v13  ;;  %v312_v55 = vld [vmem:[#allocation5 + $0x7b0] sm:$0xff]  ;;  %v357_v56 = vld [vmem:[#allocation5 + $0x918] sm:$0xff]  ;;  %v258_v59 = vld [vmem:[#allocation5 + $0x600] sm:$0xff] }
  0x37   :  { %534 = vmatpush.msrb.mxu0 %v291_v14  ;;  %553 = vmatpush.msrb.mxu1 %v342_v15  ;;  %v408_v57 = vld [vmem:[#allocation5 + $0xab0] sm:$0xff]  ;;  %v309_v60 = vld [vmem:[#allocation5 + $0x798] sm:$0xff]  ;;  %v354_v61 = vld [vmem:[#allocation5 + $0x900] sm:$0xff] }
  0x38   :  { %574 = vmatpush.msrb.mxu2 %v387_v16  ;;  %593 = vmatpush.msrb.mxu3 %v438_v17  ;;  %v1104_v58 = vld [vmem:[#allocation2 + $0x10] sm:$0xff]  ;;  %v405_v62 = vld [vmem:[#allocation5 + $0xa98] sm:$0xff]  ;;  %v1106_v63 = vld [vmem:[#allocation2] sm:$0xff] }
  0x39   :  { %535 = vmatpush.msrb.mxu0 %v288_v18  ;;  %554 = vmatpush.msrb.mxu1 %v339_v19  ;;  %v1109_v0 = vld [vmem:[#allocation2 + $0x18] sm:$0xff]  ;;  %v112_v1 = vld [vmem:[#allocation5 + $0x170] sm:$0xff]  ;;  %v306_v3 = vld [vmem:[#allocation5 + $0x780] sm:$0xff] }
  0x3a   :  { %575 = vmatpush.msrb.mxu2 %v384_v20  ;;  %594 = vmatpush.msrb.mxu3 %v435_v21  ;;  %v208_v2 = vld [vmem:[#allocation5 + $0x470] sm:$0xff]  ;;  %v402_v4 = vld [vmem:[#allocation5 + $0xa80] sm:$0xff]  ;;  %v1112_v5 = vld [vmem:[#allocation2 + $0x8] sm:$0xff] }
  0x3b   :  { %536 = vmatpush.msrb.mxu0 %v285_v22  ;;  %555 = vmatpush.msrb.mxu1 %v336_v23  ;;  %v109_v6 = vld [vmem:[#allocation5 + $0x158] sm:$0xff]  ;;  %v160_v7 = vld [vmem:[#allocation5 + $0x2f0] sm:$0xff]  ;;  %v106_v10 = vld [vmem:[#allocation5 + $0x140] sm:$0xff] }
  0x3c   :  { %576 = vmatpush.msrb.mxu2 %v381_v24  ;;  %595 = vmatpush.msrb.mxu3 %v432_v25  ;;  %v205_v8 = vld [vmem:[#allocation5 + $0x458] sm:$0xff]  ;;  %v256_v9 = vld [vmem:[#allocation5 + $0x5f0] sm:$0xff]  ;;  %v202_v12 = vld [vmem:[#allocation5 + $0x440] sm:$0xff] }
  0x3d   :  { %537 = vmatpush.msrb.mxu0 %v282_v26  ;;  %556 = vmatpush.msrb.mxu1 %v333_v27  ;;  %v157_v11 = vld [vmem:[#allocation5 + $0x2d8] sm:$0xff]  ;;  %v1116_v14 = vld [vmem:[#allocation2 + $0x30] sm:$0xff]  ;;  %v103_v15 = vld [vmem:[#allocation5 + $0x128] sm:$0xff] }
  0x3e   :  { %577 = vmatpush.msrb.mxu2 %v378_v28  ;;  %596 = vmatpush.msrb.mxu3 %v429_v29  ;;  %v253_v13 = vld [vmem:[#allocation5 + $0x5d8] sm:$0xff]  ;;  %v154_v16 = vld [vmem:[#allocation5 + $0x2c0] sm:$0xff]  ;;  %v199_v17 = vld [vmem:[#allocation5 + $0x428] sm:$0xff] }
  0x3f   :  { %538 = vmatpush.msrb.mxu0 %v279_v30  ;;  %557 = vmatpush.msrb.mxu1 %v330_v31  ;;  %v250_v18 = vld [vmem:[#allocation5 + $0x5c0] sm:$0xff]  ;;  %v1121_v20 = vld [vmem:[#allocation2 + $0x38] sm:$0xff]  ;;  %v100_v21 = vld [vmem:[#allocation5 + $0x110] sm:$0xff] }
  0x40   :  { %578 = vmatpush.msrb.mxu2 %v375_v32  ;;  %597 = vmatpush.msrb.mxu3 %v426_v33  ;;  %v1118_v19 = vld [vmem:[#allocation2 + $0x20] sm:$0xff]  ;;  %v151_v22 = vld [vmem:[#allocation5 + $0x2a8] sm:$0xff]  ;;  %v196_v23 = vld [vmem:[#allocation5 + $0x410] sm:$0xff] }
  0x41   :  { %539 = vmatpush.msrb.mxu0 %v276_v34  ;;  %558 = vmatpush.msrb.mxu1 %v327_v35  ;;  %v247_v24 = vld [vmem:[#allocation5 + $0x5a8] sm:$0xff]  ;;  %v97_v26 = vld [vmem:[#allocation5 + $0xf8] sm:$0xff]  ;;  %v148_v27 = vld [vmem:[#allocation5 + $0x290] sm:$0xff] }
  0x42   :  { %579 = vmatpush.msrb.mxu2 %v372_v36  ;;  %598 = vmatpush.msrb.mxu3 %v423_v37  ;;  %v1124_v25 = vld [vmem:[#allocation2 + $0x28] sm:$0xff]  ;;  %v193_v28 = vld [vmem:[#allocation5 + $0x3f8] sm:$0xff]  ;;  %v244_v29 = vld [vmem:[#allocation5 + $0x590] sm:$0xff] }
  0x43   :  { %540 = vmatpush.msrb.mxu0 %v273_v38  ;;  %559 = vmatpush.msrb.mxu1 %v324_v39  ;;  %v94_v30 = vld [vmem:[#allocation5 + $0xe0] sm:$0xff]  ;;  %v145_v31 = vld [vmem:[#allocation5 + $0x278] sm:$0xff]  ;;  %v91_v34 = vld [vmem:[#allocation5 + $0xc8] sm:$0xff] }
  0x44   :  { %580 = vmatpush.msrb.mxu2 %v369_v40  ;;  %599 = vmatpush.msrb.mxu3 %v420_v41  ;;  %v190_v32 = vld [vmem:[#allocation5 + $0x3e0] sm:$0xff]  ;;  %v241_v33 = vld [vmem:[#allocation5 + $0x578] sm:$0xff]  ;;  %v187_v36 = vld [vmem:[#allocation5 + $0x3c8] sm:$0xff] }
  0x45   :  { %541 = vmatpush.msrb.mxu0 %v270_v42  ;;  %560 = vmatpush.msrb.mxu1 %v321_v43  ;;  %v142_v35 = vld [vmem:[#allocation5 + $0x260] sm:$0xff]  ;;  %v88_v38 = vld [vmem:[#allocation5 + $0xb0] sm:$0xff]  ;;  %v139_v39 = vld [vmem:[#allocation5 + $0x248] sm:$0xff] }
  0x46   :  { %581 = vmatpush.msrb.mxu2 %v366_v44  ;;  %600 = vmatpush.msrb.mxu3 %v417_v45  ;;  %v238_v37 = vld [vmem:[#allocation5 + $0x560] sm:$0xff]  ;;  %v184_v40 = vld [vmem:[#allocation5 + $0x3b0] sm:$0xff]  ;;  %v235_v41 = vld [vmem:[#allocation5 + $0x548] sm:$0xff] }
  0x47   :  { %542 = vmatpush.msrb.mxu0 %v267_v46  ;;  %561 = vmatpush.msrb.mxu1 %v318_v47  ;;  %v85_v42 = vld [vmem:[#allocation5 + $0x98] sm:$0xff]  ;;  %v136_v43 = vld [vmem:[#allocation5 + $0x230] sm:$0xff]  ;;  %v82_v46 = vld [vmem:[#allocation5 + $0x80] sm:$0xff] }
  0x48   :  { %582 = vmatpush.msrb.mxu2 %v363_v48  ;;  %601 = vmatpush.msrb.mxu3 %v414_v49  ;;  %v181_v44 = vld [vmem:[#allocation5 + $0x398] sm:$0xff]  ;;  %v232_v45 = vld [vmem:[#allocation5 + $0x530] sm:$0xff]  ;;  %v178_v48 = vld [vmem:[#allocation5 + $0x380] sm:$0xff] }
  0x49   :  { %543 = vmatpush.msrb.mxu0 %v264_v50  ;;  %562 = vmatpush.msrb.mxu1 %v315_v51  ;;  %v133_v47 = vld [vmem:[#allocation5 + $0x218] sm:$0xff]  ;;  %v79_v50 = vld [vmem:[#allocation5 + $0x68] sm:$0xff]  ;;  %v130_v51 = vld [vmem:[#allocation5 + $0x200] sm:$0xff] }
  0x4a   :  { %583 = vmatpush.msrb.mxu2 %v360_v52  ;;  %602 = vmatpush.msrb.mxu3 %v411_v53  ;;  %v229_v49 = vld [vmem:[#allocation5 + $0x518] sm:$0xff]  ;;  %v175_v52 = vld [vmem:[#allocation5 + $0x368] sm:$0xff]  ;;  %v226_v53 = vld [vmem:[#allocation5 + $0x500] sm:$0xff] }
  0x4b   :  { %544 = vmatpush.msrb.mxu0 %v261_v54  ;;  %563 = vmatpush.msrb.mxu1 %v312_v55  ;;  %v76_v54 = vld [vmem:[#allocation5 + $0x50] sm:$0xff]  ;;  %v127_v55 = vld [vmem:[#allocation5 + $0x1e8] sm:$0xff] }
  0x4c   :  { %584 = vmatpush.msrb.mxu2 %v357_v56  ;;  %603 = vmatpush.msrb.mxu3 %v408_v57  ;;  %v172_v56 = vld [vmem:[#allocation5 + $0x350] sm:$0xff]  ;;  %v223_v57 = vld [vmem:[#allocation5 + $0x4e8] sm:$0xff] }
  0x4d   :  { %506 = vmatmul.f32.vlgmr.msra.gmra.mxu2 %v1104_v58  ;;  %545 = vmatpush.msrb.mxu0 %v258_v59  ;;  %v73_v59 = vld [vmem:[#allocation5 + $0x38] sm:$0xff] }
  0x4e   :  { %564 = vmatpush.msrb.mxu1 %v309_v60  ;;  %585 = vmatpush.msrb.mxu2 %v354_v61  ;;  %v124_v60 = vld [vmem:[#allocation5 + $0x1d0] sm:$0xff]  ;;  %v169_v61 = vld [vmem:[#allocation5 + $0x338] sm:$0xff] }
  0x4f   :  { %604 = vmatpush.msrb.mxu3 %v405_v62  ;;  %466 = vmatmul.f32.vlgmr.msra.gmra.mxu0 %v1106_v63  ;;  %v220_v62 = vld [vmem:[#allocation5 + $0x4d0] sm:$0xff] }
  0x50   :  { %526 = vmatmul.f32.vlgmr.msra.gmra.mxu3 %v1109_v0  ;;  %610 = vmatpush.msra.mxu0 %v112_v1  ;;  %v70_v1 = vld [vmem:[#allocation5 + $0x20] sm:$0xff] }
  0x51   :  { %650 = vmatpush.msra.mxu2 %v208_v2  ;;  %565 = vmatpush.msrb.mxu1 %v306_v3  ;;  %v121_v2 = vld [vmem:[#allocation5 + $0x1b8] sm:$0xff]  ;;  %v166_v3 = vld [vmem:[#allocation5 + $0x320] sm:$0xff] }
  0x52   :  { %605 = vmatpush.msrb.mxu3 %v402_v4  ;;  %486 = vmatmul.f32.vlgmr.msra.gmra.mxu1 %v1112_v5  ;;  %v217_v4 = vld [vmem:[#allocation5 + $0x4b8] sm:$0xff] }
  0x53   :  { %611 = vmatpush.msra.mxu0 %v109_v6  ;;  %630 = vmatpush.msra.mxu1 %v160_v7  ;;  %v67_v6 = vld [vmem:[#allocation5 + $0x8] sm:$0xff]  ;;  %v118_v7 = vld [vmem:[#allocation5 + $0x1a0] sm:$0xff] }
  0x54   :  { %651 = vmatpush.msra.mxu2 %v205_v8  ;;  %670 = vmatpush.msra.mxu3 %v256_v9  ;;  %v163_v8 = vld [vmem:[#allocation5 + $0x308] sm:$0xff]  ;;  %v214_v9 = vld [vmem:[#allocation5 + $0x4a0] sm:$0xff] }
  0x55   :  { %612 = vmatpush.msra.mxu0 %v106_v10  ;;  %631 = vmatpush.msra.mxu1 %v157_v11  ;;  %v304_v10 = vld [vmem:[#allocation5 + $0x770] sm:$0xff] }
  0x56   :  { %652 = vmatpush.msra.mxu2 %v202_v12  ;;  %671 = vmatpush.msra.mxu3 %v253_v13  ;;  %v400_v11 = vld [vmem:[#allocation5 + $0xa70] sm:$0xff]  ;;  %v115_v12 = vld [vmem:[#allocation5 + $0x188] sm:$0xff] }
  0x57   :  { %586 = vmatmul.f32.vlgmr.msrb.gmra.mxu2 %v1116_v14  ;;  %613 = vmatpush.msra.mxu0 %v103_v15  ;;  %v211_v13 = vld [vmem:[#allocation5 + $0x488] sm:$0xff]  ;;  %v301_v15 = vld [vmem:[#allocation5 + $0x758] sm:$0xff] }
  0x58   :  { %632 = vmatpush.msra.mxu1 %v154_v16  ;;  %653 = vmatpush.msra.mxu2 %v199_v17  ;;  %v352_v16 = vld [vmem:[#allocation5 + $0x8f0] sm:$0xff]  ;;  %v397_v17 = vld [vmem:[#allocation5 + $0xa58] sm:$0xff] }
  0x59   :  { %672 = vmatpush.msra.mxu3 %v250_v18  ;;  %546 = vmatmul.f32.vlgmr.msrb.gmra.mxu0 %v1118_v19  ;;  %v448_v18 = vld [vmem:[#allocation5 + $0xbf0] sm:$0xff] }
  0x5a   :  { %606 = vmatmul.f32.vlgmr.msrb.gmra.mxu3 %v1121_v20  ;;  %614 = vmatpush.msra.mxu0 %v100_v21  ;;  %v298_v21 = vld [vmem:[#allocation5 + $0x740] sm:$0xff] }
  0x5b   :  { %633 = vmatpush.msra.mxu1 %v151_v22  ;;  %654 = vmatpush.msra.mxu2 %v196_v23  ;;  %v349_v22 = vld [vmem:[#allocation5 + $0x8d8] sm:$0xff]  ;;  %v394_v23 = vld [vmem:[#allocation5 + $0xa40] sm:$0xff] }
  0x5c   :  { %673 = vmatpush.msra.mxu3 %v247_v24  ;;  %566 = vmatmul.f32.vlgmr.msrb.gmra.mxu1 %v1124_v25  ;;  %v445_v24 = vld [vmem:[#allocation5 + $0xbd8] sm:$0xff] }
  0x5d   :  { %615 = vmatpush.msra.mxu0 %v97_v26  ;;  %634 = vmatpush.msra.mxu1 %v148_v27  ;;  %v295_v26 = vld [vmem:[#allocation5 + $0x728] sm:$0xff]  ;;  %v346_v27 = vld [vmem:[#allocation5 + $0x8c0] sm:$0xff] }
  0x5e   :  { %655 = vmatpush.msra.mxu2 %v193_v28  ;;  %674 = vmatpush.msra.mxu3 %v244_v29  ;;  %v391_v28 = vld [vmem:[#allocation5 + $0xa28] sm:$0xff]  ;;  %v442_v29 = vld [vmem:[#allocation5 + $0xbc0] sm:$0xff] }
  0x5f   :  { %616 = vmatpush.msra.mxu0 %v94_v30  ;;  %635 = vmatpush.msra.mxu1 %v145_v31  ;;  %v292_v30 = vld [vmem:[#allocation5 + $0x710] sm:$0xff]  ;;  %v343_v31 = vld [vmem:[#allocation5 + $0x8a8] sm:$0xff] }
  0x60   :  { %656 = vmatpush.msra.mxu2 %v190_v32  ;;  %675 = vmatpush.msra.mxu3 %v241_v33  ;;  %v388_v32 = vld [vmem:[#allocation5 + $0xa10] sm:$0xff]  ;;  %v439_v33 = vld [vmem:[#allocation5 + $0xba8] sm:$0xff] }
  0x61   :  { %617 = vmatpush.msra.mxu0 %v91_v34  ;;  %636 = vmatpush.msra.mxu1 %v142_v35  ;;  %v289_v34 = vld [vmem:[#allocation5 + $0x6f8] sm:$0xff]  ;;  %v340_v35 = vld [vmem:[#allocation5 + $0x890] sm:$0xff] }
  0x62   :  { %657 = vmatpush.msra.mxu2 %v187_v36  ;;  %676 = vmatpush.msra.mxu3 %v238_v37  ;;  %v385_v36 = vld [vmem:[#allocation5 + $0x9f8] sm:$0xff]  ;;  %v436_v37 = vld [vmem:[#allocation5 + $0xb90] sm:$0xff] }
  0x63   :  { %618 = vmatpush.msra.mxu0 %v88_v38  ;;  %637 = vmatpush.msra.mxu1 %v139_v39  ;;  %v286_v38 = vld [vmem:[#allocation5 + $0x6e0] sm:$0xff]  ;;  %v337_v39 = vld [vmem:[#allocation5 + $0x878] sm:$0xff] }
  0x64   :  { %658 = vmatpush.msra.mxu2 %v184_v40  ;;  %677 = vmatpush.msra.mxu3 %v235_v41  ;;  %v382_v40 = vld [vmem:[#allocation5 + $0x9e0] sm:$0xff]  ;;  %v433_v41 = vld [vmem:[#allocation5 + $0xb78] sm:$0xff] }
  0x65   :  { %619 = vmatpush.msra.mxu0 %v85_v42  ;;  %638 = vmatpush.msra.mxu1 %v136_v43  ;;  %v283_v42 = vld [vmem:[#allocation5 + $0x6c8] sm:$0xff]  ;;  %v334_v43 = vld [vmem:[#allocation5 + $0x860] sm:$0xff] }
  0x66   :  { %659 = vmatpush.msra.mxu2 %v181_v44  ;;  %678 = vmatpush.msra.mxu3 %v232_v45  ;;  %v379_v44 = vld [vmem:[#allocation5 + $0x9c8] sm:$0xff]  ;;  %v430_v45 = vld [vmem:[#allocation5 + $0xb60] sm:$0xff] }
  0x67   :  { %620 = vmatpush.msra.mxu0 %v82_v46  ;;  %639 = vmatpush.msra.mxu1 %v133_v47  ;;  %v280_v46 = vld [vmem:[#allocation5 + $0x6b0] sm:$0xff]  ;;  %v331_v47 = vld [vmem:[#allocation5 + $0x848] sm:$0xff] }
  0x68   :  { %660 = vmatpush.msra.mxu2 %v178_v48  ;;  %679 = vmatpush.msra.mxu3 %v229_v49  ;;  %v376_v48 = vld [vmem:[#allocation5 + $0x9b0] sm:$0xff]  ;;  %v427_v49 = vld [vmem:[#allocation5 + $0xb48] sm:$0xff] }
  0x69   :  { %621 = vmatpush.msra.mxu0 %v79_v50  ;;  %640 = vmatpush.msra.mxu1 %v130_v51  ;;  %v277_v50 = vld [vmem:[#allocation5 + $0x698] sm:$0xff]  ;;  %v328_v51 = vld [vmem:[#allocation5 + $0x830] sm:$0xff] }
  0x6a   :  { %661 = vmatpush.msra.mxu2 %v175_v52  ;;  %680 = vmatpush.msra.mxu3 %v226_v53  ;;  %v373_v52 = vld [vmem:[#allocation5 + $0x998] sm:$0xff]  ;;  %v424_v53 = vld [vmem:[#allocation5 + $0xb30] sm:$0xff] }
  0x6b   :  { %622 = vmatpush.msra.mxu0 %v76_v54  ;;  %641 = vmatpush.msra.mxu1 %v127_v55  ;;  %v274_v54 = vld [vmem:[#allocation5 + $0x680] sm:$0xff]  ;;  %v325_v55 = vld [vmem:[#allocation5 + $0x818] sm:$0xff] }
  0x6c   :  { %662 = vmatpush.msra.mxu2 %v172_v56  ;;  %681 = vmatpush.msra.mxu3 %v223_v57  ;;  %v370_v56 = vld [vmem:[#allocation5 + $0x980] sm:$0xff]  ;;  %v421_v57 = vld [vmem:[#allocation5 + $0xb18] sm:$0xff] }
  0x6d   :  { %623 = vmatpush.msra.mxu0 %v73_v59  ;;  %642 = vmatpush.msra.mxu1 %v124_v60  ;;  %v271_v59 = vld [vmem:[#allocation5 + $0x668] sm:$0xff]  ;;  %v322_v60 = vld [vmem:[#allocation5 + $0x800] sm:$0xff] }
  0x6e   :  { %663 = vmatpush.msra.mxu2 %v169_v61  ;;  %682 = vmatpush.msra.mxu3 %v220_v62  ;;  %v367_v61 = vld [vmem:[#allocation5 + $0x968] sm:$0xff]  ;;  %v418_v62 = vld [vmem:[#allocation5 + $0xb00] sm:$0xff] }
  0x6f   :  { %624 = vmatpush.msra.mxu0 %v70_v1  ;;  %643 = vmatpush.msra.mxu1 %v121_v2  ;;  %v268_v1 = vld [vmem:[#allocation5 + $0x650] sm:$0xff]  ;;  %v319_v2 = vld [vmem:[#allocation5 + $0x7e8] sm:$0xff] }
  0x70   :  { %664 = vmatpush.msra.mxu2 %v166_v3  ;;  %683 = vmatpush.msra.mxu3 %v217_v4  ;;  %v364_v3 = vld [vmem:[#allocation5 + $0x950] sm:$0xff]  ;;  %v415_v4 = vld [vmem:[#allocation5 + $0xae8] sm:$0xff] }
  0x71   :  { %625 = vmatpush.msra.mxu0 %v67_v6  ;;  %644 = vmatpush.msra.mxu1 %v118_v7  ;;  %v265_v6 = vld [vmem:[#allocation5 + $0x638] sm:$0xff]  ;;  %v316_v7 = vld [vmem:[#allocation5 + $0x7d0] sm:$0xff] }
  0x72   :  { %665 = vmatpush.msra.mxu2 %v163_v8  ;;  %684 = vmatpush.msra.mxu3 %v214_v9  ;;  %v361_v8 = vld [vmem:[#allocation5 + $0x938] sm:$0xff]  ;;  %v412_v9 = vld [vmem:[#allocation5 + $0xad0] sm:$0xff] }
  0x73   :  { %690 = vmatpush.msrb.mxu0 %v304_v10  ;;  %645 = vmatpush.msra.mxu1 %v115_v12  ;;  %v262_v10 = vld [vmem:[#allocation5 + $0x620] sm:$0xff] }
  0x74   :  { %730 = vmatpush.msrb.mxu2 %v400_v11  ;;  %685 = vmatpush.msra.mxu3 %v211_v13  ;;  %v313_v11 = vld [vmem:[#allocation5 + $0x7b8] sm:$0xff]  ;;  %v358_v12 = vld [vmem:[#allocation5 + $0x920] sm:$0xff] }
  0x75   :  { %691 = vmatpush.msrb.mxu0 %v301_v15  ;;  %710 = vmatpush.msrb.mxu1 %v352_v16  ;;  %v409_v13 = vld [vmem:[#allocation5 + $0xab8] sm:$0xff]  ;;  %v310_v15 = vld [vmem:[#allocation5 + $0x7a0] sm:$0xff]  ;;  %v355_v16 = vld [vmem:[#allocation5 + $0x908] sm:$0xff] }
  0x76   :  { %731 = vmatpush.msrb.mxu2 %v397_v17  ;;  %750 = vmatpush.msrb.mxu3 %v448_v18  ;;  %v406_v17 = vld [vmem:[#allocation5 + $0xaa0] sm:$0xff]  ;;  %v209_v18 = vld [vmem:[#allocation5 + $0x478] sm:$0xff] }
  0x77   :  { %692 = vmatpush.msrb.mxu0 %v298_v21  ;;  %711 = vmatpush.msrb.mxu1 %v349_v22  ;;  %v307_v21 = vld [vmem:[#allocation5 + $0x788] sm:$0xff] }
  0x78   :  { %732 = vmatpush.msrb.mxu2 %v394_v23  ;;  %751 = vmatpush.msrb.mxu3 %v445_v24  ;;  %v403_v22 = vld [vmem:[#allocation5 + $0xa88] sm:$0xff]  ;;  %v110_v23 = vld [vmem:[#allocation5 + $0x160] sm:$0xff]  ;;  %v161_v24 = vld [vmem:[#allocation5 + $0x2f8] sm:$0xff] }
  0x79   :  { %693 = vmatpush.msrb.mxu0 %v295_v26  ;;  %712 = vmatpush.msrb.mxu1 %v346_v27  ;;  %v206_v26 = vld [vmem:[#allocation5 + $0x460] sm:$0xff]  ;;  %v257_v27 = vld [vmem:[#allocation5 + $0x5f8] sm:$0xff] }
  0x7a   :  { %733 = vmatpush.msrb.mxu2 %v391_v28  ;;  %752 = vmatpush.msrb.mxu3 %v442_v29  ;;  %v107_v28 = vld [vmem:[#allocation5 + $0x148] sm:$0xff]  ;;  %v158_v29 = vld [vmem:[#allocation5 + $0x2e0] sm:$0xff] }
  0x7b   :  { %694 = vmatpush.msrb.mxu0 %v292_v30  ;;  %713 = vmatpush.msrb.mxu1 %v343_v31  ;;  %v203_v30 = vld [vmem:[#allocation5 + $0x448] sm:$0xff]  ;;  %v254_v31 = vld [vmem:[#allocation5 + $0x5e0] sm:$0xff] }
  0x7c   :  { %734 = vmatpush.msrb.mxu2 %v388_v32  ;;  %753 = vmatpush.msrb.mxu3 %v439_v33  ;;  %v155_v32 = vld [vmem:[#allocation5 + $0x2c8] sm:$0xff]  ;;  %v200_v33 = vld [vmem:[#allocation5 + $0x430] sm:$0xff] }
  0x7d   :  { %695 = vmatpush.msrb.mxu0 %v289_v34  ;;  %714 = vmatpush.msrb.mxu1 %v340_v35  ;;  %v251_v34 = vld [vmem:[#allocation5 + $0x5c8] sm:$0xff]  ;;  %v101_v35 = vld [vmem:[#allocation5 + $0x118] sm:$0xff] }
  0x7e   :  { %735 = vmatpush.msrb.mxu2 %v385_v36  ;;  %754 = vmatpush.msrb.mxu3 %v436_v37  ;;  %v152_v36 = vld [vmem:[#allocation5 + $0x2b0] sm:$0xff]  ;;  %v197_v37 = vld [vmem:[#allocation5 + $0x418] sm:$0xff] }
  0x7f   :  { %696 = vmatpush.msrb.mxu0 %v286_v38  ;;  %715 = vmatpush.msrb.mxu1 %v337_v39  ;;  %v248_v38 = vld [vmem:[#allocation5 + $0x5b0] sm:$0xff]  ;;  %v98_v39 = vld [vmem:[#allocation5 + $0x100] sm:$0xff] }
  0x80   :  { %736 = vmatpush.msrb.mxu2 %v382_v40  ;;  %755 = vmatpush.msrb.mxu3 %v433_v41  ;;  %v149_v40 = vld [vmem:[#allocation5 + $0x298] sm:$0xff]  ;;  %v194_v41 = vld [vmem:[#allocation5 + $0x400] sm:$0xff] }
  0x81   :  { %697 = vmatpush.msrb.mxu0 %v283_v42  ;;  %716 = vmatpush.msrb.mxu1 %v334_v43  ;;  %v245_v42 = vld [vmem:[#allocation5 + $0x598] sm:$0xff]  ;;  %v95_v43 = vld [vmem:[#allocation5 + $0xe8] sm:$0xff] }
  0x82   :  { %737 = vmatpush.msrb.mxu2 %v379_v44  ;;  %756 = vmatpush.msrb.mxu3 %v430_v45  ;;  %v146_v44 = vld [vmem:[#allocation5 + $0x280] sm:$0xff]  ;;  %v191_v45 = vld [vmem:[#allocation5 + $0x3e8] sm:$0xff] }
  0x83   :  { %698 = vmatpush.msrb.mxu0 %v280_v46  ;;  %717 = vmatpush.msrb.mxu1 %v331_v47  ;;  %v242_v46 = vld [vmem:[#allocation5 + $0x580] sm:$0xff]  ;;  %v92_v47 = vld [vmem:[#allocation5 + $0xd0] sm:$0xff] }
  0x84   :  { %738 = vmatpush.msrb.mxu2 %v376_v48  ;;  %757 = vmatpush.msrb.mxu3 %v427_v49  ;;  %v143_v48 = vld [vmem:[#allocation5 + $0x268] sm:$0xff]  ;;  %v188_v49 = vld [vmem:[#allocation5 + $0x3d0] sm:$0xff] }
  0x85   :  { %699 = vmatpush.msrb.mxu0 %v277_v50  ;;  %718 = vmatpush.msrb.mxu1 %v328_v51  ;;  %v239_v50 = vld [vmem:[#allocation5 + $0x568] sm:$0xff]  ;;  %v89_v51 = vld [vmem:[#allocation5 + $0xb8] sm:$0xff] }
  0x86   :  { %739 = vmatpush.msrb.mxu2 %v373_v52  ;;  %758 = vmatpush.msrb.mxu3 %v424_v53  ;;  %v140_v52 = vld [vmem:[#allocation5 + $0x250] sm:$0xff]  ;;  %v185_v53 = vld [vmem:[#allocation5 + $0x3b8] sm:$0xff] }
  0x87   :  { %700 = vmatpush.msrb.mxu0 %v274_v54  ;;  %719 = vmatpush.msrb.mxu1 %v325_v55  ;;  %v236_v54 = vld [vmem:[#allocation5 + $0x550] sm:$0xff]  ;;  %v86_v55 = vld [vmem:[#allocation5 + $0xa0] sm:$0xff] }
  0x88   :  { %740 = vmatpush.msrb.mxu2 %v370_v56  ;;  %759 = vmatpush.msrb.mxu3 %v421_v57  ;;  %v137_v56 = vld [vmem:[#allocation5 + $0x238] sm:$0xff]  ;;  %v182_v57 = vld [vmem:[#allocation5 + $0x3a0] sm:$0xff] }
  0x89   :  { %701 = vmatpush.msrb.mxu0 %v271_v59  ;;  %720 = vmatpush.msrb.mxu1 %v322_v60  ;;  %v233_v59 = vld [vmem:[#allocation5 + $0x538] sm:$0xff]  ;;  %v83_v60 = vld [vmem:[#allocation5 + $0x88] sm:$0xff] }
  0x8a   :  { %741 = vmatpush.msrb.mxu2 %v367_v61  ;;  %760 = vmatpush.msrb.mxu3 %v418_v62  ;;  %v134_v61 = vld [vmem:[#allocation5 + $0x220] sm:$0xff]  ;;  %v179_v62 = vld [vmem:[#allocation5 + $0x388] sm:$0xff] }
  0x8b   :  { %666 = vmatmul.f32.vlgmr.msra.gmra.mxu2 %v1104_v58  ;;  %702 = vmatpush.msrb.mxu0 %v268_v1  ;;  %v259_v58 = vld [vmem:[#allocation5 + $0x608] sm:$0xff]  ;;  %v230_v1 = vld [vmem:[#allocation5 + $0x520] sm:$0xff] }
  0x8c   :  { %721 = vmatpush.msrb.mxu1 %v319_v2  ;;  %742 = vmatpush.msrb.mxu2 %v364_v3  ;;  %v80_v2 = vld [vmem:[#allocation5 + $0x70] sm:$0xff]  ;;  %v131_v3 = vld [vmem:[#allocation5 + $0x208] sm:$0xff] }
  0x8d   :  { %761 = vmatpush.msrb.mxu3 %v415_v4  ;;  %626 = vmatmul.f32.vlgmr.msra.gmra.mxu0 %v1106_v63  ;;  %v113_v63 = vld [vmem:[#allocation5 + $0x178] sm:$0xff]  ;;  %v176_v4 = vld [vmem:[#allocation5 + $0x370] sm:$0xff] }
  0x8e   :  { %686 = vmatmul.f32.vlgmr.msra.gmra.mxu3 %v1109_v0  ;;  %703 = vmatpush.msrb.mxu0 %v265_v6  ;;  %v227_v6 = vld [vmem:[#allocation5 + $0x508] sm:$0xff] }
  0x8f   :  { %722 = vmatpush.msrb.mxu1 %v316_v7  ;;  %743 = vmatpush.msrb.mxu2 %v361_v8  ;;  %v77_v7 = vld [vmem:[#allocation5 + $0x58] sm:$0xff]  ;;  %v128_v8 = vld [vmem:[#allocation5 + $0x1f0] sm:$0xff] }
  0x90   :  { %762 = vmatpush.msrb.mxu3 %v412_v9  ;;  %646 = vmatmul.f32.vlgmr.msra.gmra.mxu1 %v1112_v5  ;;  %v173_v9 = vld [vmem:[#allocation5 + $0x358] sm:$0xff] }
  0x91   :  { %704 = vmatpush.msrb.mxu0 %v262_v10  ;;  %723 = vmatpush.msrb.mxu1 %v313_v11  ;;  %v224_v10 = vld [vmem:[#allocation5 + $0x4f0] sm:$0xff]  ;;  %v74_v11 = vld [vmem:[#allocation5 + $0x40] sm:$0xff] }
  0x92   :  { %744 = vmatpush.msrb.mxu2 %v358_v12  ;;  %763 = vmatpush.msrb.mxu3 %v409_v13  ;;  %v125_v12 = vld [vmem:[#allocation5 + $0x1d8] sm:$0xff]  ;;  %v170_v13 = vld [vmem:[#allocation5 + $0x340] sm:$0xff] }
  0x93   :  { %705 = vmatpush.msrb.mxu0 %v259_v58  ;;  %724 = vmatpush.msrb.mxu1 %v310_v15  ;;  %v221_v58 = vld [vmem:[#allocation5 + $0x4d8] sm:$0xff]  ;;  %v71_v15 = vld [vmem:[#allocation5 + $0x28] sm:$0xff] }
  0x94   :  { %745 = vmatpush.msrb.mxu2 %v355_v16  ;;  %764 = vmatpush.msrb.mxu3 %v406_v17  ;;  %v122_v16 = vld [vmem:[#allocation5 + $0x1c0] sm:$0xff]  ;;  %v167_v17 = vld [vmem:[#allocation5 + $0x328] sm:$0xff] }
  0x95   :  { %746 = vmatmul.f32.vlgmr.msrb.gmra.mxu2 %v1116_v14  ;;  %770 = vmatpush.msra.mxu0 %v113_v63  ;;  %v104_v14 = vld [vmem:[#allocation5 + $0x130] sm:$0xff]  ;;  %v218_v63 = vld [vmem:[#allocation5 + $0x4c0] sm:$0xff] }
  0x96   :  { %810 = vmatpush.msra.mxu2 %v209_v18  ;;  %725 = vmatpush.msrb.mxu1 %v307_v21  ;;  %v68_v18 = vld [vmem:[#allocation5 + $0x10] sm:$0xff]  ;;  %v119_v21 = vld [vmem:[#allocation5 + $0x1a8] sm:$0xff] }
  0x97   :  { %765 = vmatpush.msrb.mxu3 %v403_v22  ;;  %706 = vmatmul.f32.vlgmr.msrb.gmra.mxu0 %v1118_v19  ;;  %v164_v22 = vld [vmem:[#allocation5 + $0x310] sm:$0xff] }
  0x98   :  { %766 = vmatmul.f32.vlgmr.msrb.gmra.mxu3 %v1121_v20  ;;  %771 = vmatpush.msra.mxu0 %v110_v23  ;;  %v215_v23 = vld [vmem:[#allocation5 + $0x4a8] sm:$0xff] }
  0x99   :  { %790 = vmatpush.msra.mxu1 %v161_v24  ;;  %811 = vmatpush.msra.mxu2 %v206_v26  ;;  %v305_v24 = vld [vmem:[#allocation5 + $0x778] sm:$0xff] }
  0x9a   :  { %830 = vmatpush.msra.mxu3 %v257_v27  ;;  %726 = vmatmul.f32.vlgmr.msrb.gmra.mxu1 %v1124_v25  ;;  %v401_v26 = vld [vmem:[#allocation5 + $0xa78] sm:$0xff]  ;;  %v116_v27 = vld [vmem:[#allocation5 + $0x190] sm:$0xff] }
  0x9b   :  { %772 = vmatpush.msra.mxu0 %v107_v28  ;;  %791 = vmatpush.msra.mxu1 %v158_v29  ;;  %v212_v28 = vld [vmem:[#allocation5 + $0x490] sm:$0xff]  ;;  %v302_v29 = vld [vmem:[#allocation5 + $0x760] sm:$0xff] }
  0x9c   :  { %812 = vmatpush.msra.mxu2 %v203_v30  ;;  %831 = vmatpush.msra.mxu3 %v254_v31  ;;  %v353_v30 = vld [vmem:[#allocation5 + $0x8f8] sm:$0xff]  ;;  %v398_v31 = vld [vmem:[#allocation5 + $0xa60] sm:$0xff] }
  0x9d   :  { %773 = vmatpush.msra.mxu0 %v104_v14  ;;  %792 = vmatpush.msra.mxu1 %v155_v32  ;;  %v449_v14 = vld [vmem:[#allocation5 + $0xbf8] sm:$0xff]  ;;  %v299_v32 = vld [vmem:[#allocation5 + $0x748] sm:$0xff] }
  0x9e   :  { %813 = vmatpush.msra.mxu2 %v200_v33  ;;  %832 = vmatpush.msra.mxu3 %v251_v34  ;;  %v350_v33 = vld [vmem:[#allocation5 + $0x8e0] sm:$0xff]  ;;  %v395_v34 = vld [vmem:[#allocation5 + $0xa48] sm:$0xff] }
  0x9f   :  { %774 = vmatpush.msra.mxu0 %v101_v35  ;;  %793 = vmatpush.msra.mxu1 %v152_v36  ;;  %v446_v35 = vld [vmem:[#allocation5 + $0xbe0] sm:$0xff]  ;;  %v296_v36 = vld [vmem:[#allocation5 + $0x730] sm:$0xff] }
  0xa0   :  { %814 = vmatpush.msra.mxu2 %v197_v37  ;;  %833 = vmatpush.msra.mxu3 %v248_v38  ;;  %v347_v37 = vld [vmem:[#allocation5 + $0x8c8] sm:$0xff]  ;;  %v392_v38 = vld [vmem:[#allocation5 + $0xa30] sm:$0xff] }
  0xa1   :  { %775 = vmatpush.msra.mxu0 %v98_v39  ;;  %794 = vmatpush.msra.mxu1 %v149_v40  ;;  %v443_v39 = vld [vmem:[#allocation5 + $0xbc8] sm:$0xff]  ;;  %v293_v40 = vld [vmem:[#allocation5 + $0x718] sm:$0xff] }
  0xa2   :  { %815 = vmatpush.msra.mxu2 %v194_v41  ;;  %834 = vmatpush.msra.mxu3 %v245_v42  ;;  %v344_v41 = vld [vmem:[#allocation5 + $0x8b0] sm:$0xff]  ;;  %v389_v42 = vld [vmem:[#allocation5 + $0xa18] sm:$0xff] }
  0xa3   :  { %776 = vmatpush.msra.mxu0 %v95_v43  ;;  %795 = vmatpush.msra.mxu1 %v146_v44  ;;  %v440_v43 = vld [vmem:[#allocation5 + $0xbb0] sm:$0xff]  ;;  %v290_v44 = vld [vmem:[#allocation5 + $0x700] sm:$0xff] }
  0xa4   :  { %816 = vmatpush.msra.mxu2 %v191_v45  ;;  %835 = vmatpush.msra.mxu3 %v242_v46  ;;  %v341_v45 = vld [vmem:[#allocation5 + $0x898] sm:$0xff]  ;;  %v386_v46 = vld [vmem:[#allocation5 + $0xa00] sm:$0xff] }
  0xa5   :  { %777 = vmatpush.msra.mxu0 %v92_v47  ;;  %796 = vmatpush.msra.mxu1 %v143_v48  ;;  %v437_v47 = vld [vmem:[#allocation5 + $0xb98] sm:$0xff]  ;;  %v287_v48 = vld [vmem:[#allocation5 + $0x6e8] sm:$0xff] }
  0xa6   :  { %817 = vmatpush.msra.mxu2 %v188_v49  ;;  %836 = vmatpush.msra.mxu3 %v239_v50  ;;  %v338_v49 = vld [vmem:[#allocation5 + $0x880] sm:$0xff]  ;;  %v383_v50 = vld [vmem:[#allocation5 + $0x9e8] sm:$0xff] }
  0xa7   :  { %778 = vmatpush.msra.mxu0 %v89_v51  ;;  %797 = vmatpush.msra.mxu1 %v140_v52  ;;  %v434_v51 = vld [vmem:[#allocation5 + $0xb80] sm:$0xff]  ;;  %v284_v52 = vld [vmem:[#allocation5 + $0x6d0] sm:$0xff] }
  0xa8   :  { %818 = vmatpush.msra.mxu2 %v185_v53  ;;  %837 = vmatpush.msra.mxu3 %v236_v54  ;;  %v335_v53 = vld [vmem:[#allocation5 + $0x868] sm:$0xff]  ;;  %v380_v54 = vld [vmem:[#allocation5 + $0x9d0] sm:$0xff] }
  0xa9   :  { %779 = vmatpush.msra.mxu0 %v86_v55  ;;  %798 = vmatpush.msra.mxu1 %v137_v56  ;;  %v431_v55 = vld [vmem:[#allocation5 + $0xb68] sm:$0xff]  ;;  %v281_v56 = vld [vmem:[#allocation5 + $0x6b8] sm:$0xff] }
  0xaa   :  { %819 = vmatpush.msra.mxu2 %v182_v57  ;;  %838 = vmatpush.msra.mxu3 %v233_v59  ;;  %v332_v57 = vld [vmem:[#allocation5 + $0x850] sm:$0xff]  ;;  %v377_v59 = vld [vmem:[#allocation5 + $0x9b8] sm:$0xff] }
  0xab   :  { %780 = vmatpush.msra.mxu0 %v83_v60  ;;  %799 = vmatpush.msra.mxu1 %v134_v61  ;;  %v428_v60 = vld [vmem:[#allocation5 + $0xb50] sm:$0xff]  ;;  %v278_v61 = vld [vmem:[#allocation5 + $0x6a0] sm:$0xff] }
  0xac   :  { %820 = vmatpush.msra.mxu2 %v179_v62  ;;  %839 = vmatpush.msra.mxu3 %v230_v1  ;;  %v329_v62 = vld [vmem:[#allocation5 + $0x838] sm:$0xff]  ;;  %v374_v1 = vld [vmem:[#allocation5 + $0x9a0] sm:$0xff] }
  0xad   :  { %781 = vmatpush.msra.mxu0 %v80_v2  ;;  %800 = vmatpush.msra.mxu1 %v131_v3  ;;  %v425_v2 = vld [vmem:[#allocation5 + $0xb38] sm:$0xff]  ;;  %v275_v3 = vld [vmem:[#allocation5 + $0x688] sm:$0xff] }
  0xae   :  { %821 = vmatpush.msra.mxu2 %v176_v4  ;;  %840 = vmatpush.msra.mxu3 %v227_v6  ;;  %v326_v4 = vld [vmem:[#allocation5 + $0x820] sm:$0xff]  ;;  %v371_v6 = vld [vmem:[#allocation5 + $0x988] sm:$0xff] }
  0xaf   :  { %782 = vmatpush.msra.mxu0 %v77_v7  ;;  %801 = vmatpush.msra.mxu1 %v128_v8  ;;  %v422_v7 = vld [vmem:[#allocation5 + $0xb20] sm:$0xff]  ;;  %v272_v8 = vld [vmem:[#allocation5 + $0x670] sm:$0xff] }
  0xb0   :  { %822 = vmatpush.msra.mxu2 %v173_v9  ;;  %841 = vmatpush.msra.mxu3 %v224_v10  ;;  %v323_v9 = vld [vmem:[#allocation5 + $0x808] sm:$0xff]  ;;  %v368_v10 = vld [vmem:[#allocation5 + $0x970] sm:$0xff] }
  0xb1   :  { %783 = vmatpush.msra.mxu0 %v74_v11  ;;  %802 = vmatpush.msra.mxu1 %v125_v12  ;;  %v419_v11 = vld [vmem:[#allocation5 + $0xb08] sm:$0xff]  ;;  %v964_v12 = vld [vmem:[#allocation2 + $0x10] sm:$0xff] }
  0xb2   :  { %823 = vmatpush.msra.mxu2 %v170_v13  ;;  %842 = vmatpush.msra.mxu3 %v221_v58  ;;  %v269_v13 = vld [vmem:[#allocation5 + $0x658] sm:$0xff]  ;;  %v320_v58 = vld [vmem:[#allocation5 + $0x7f0] sm:$0xff] }
  0xb3   :  { %784 = vmatpush.msra.mxu0 %v71_v15  ;;  %803 = vmatpush.msra.mxu1 %v122_v16  ;;  %v365_v15 = vld [vmem:[#allocation5 + $0x958] sm:$0xff]  ;;  %v965_v16 = vld [vmem:[#allocation2] sm:$0xff] }
  0xb4   :  { %824 = vmatpush.msra.mxu2 %v167_v17  ;;  %843 = vmatpush.msra.mxu3 %v218_v63  ;;  %v416_v17 = vld [vmem:[#allocation5 + $0xaf0] sm:$0xff]  ;;  %v266_v63 = vld [vmem:[#allocation5 + $0x640] sm:$0xff] }
  0xb5   :  { %785 = vmatpush.msra.mxu0 %v68_v18  ;;  %804 = vmatpush.msra.mxu1 %v119_v21  ;;  %v317_v18 = vld [vmem:[#allocation5 + $0x7d8] sm:$0xff]  ;;  %v362_v21 = vld [vmem:[#allocation5 + $0x940] sm:$0xff] }
  0xb6   :  { %825 = vmatpush.msra.mxu2 %v164_v22  ;;  %844 = vmatpush.msra.mxu3 %v215_v23  ;;  %v413_v22 = vld [vmem:[#allocation5 + $0xad8] sm:$0xff]  ;;  %v263_v23 = vld [vmem:[#allocation5 + $0x628] sm:$0xff] }
  0xb7   :  { %850 = vmatpush.msrb.mxu0 %v305_v24  ;;  %805 = vmatpush.msra.mxu1 %v116_v27  ;;  %v314_v24 = vld [vmem:[#allocation5 + $0x7c0] sm:$0xff] }
  0xb8   :  { %890 = vmatpush.msrb.mxu2 %v401_v26  ;;  %845 = vmatpush.msra.mxu3 %v212_v28  ;;  %v359_v26 = vld [vmem:[#allocation5 + $0x928] sm:$0xff]  ;;  %v410_v27 = vld [vmem:[#allocation5 + $0xac0] sm:$0xff]  ;;  %v260_v28 = vld [vmem:[#allocation5 + $0x610] sm:$0xff] }
  0xb9   :  { %851 = vmatpush.msrb.mxu0 %v302_v29  ;;  %870 = vmatpush.msrb.mxu1 %v353_v30  ;;  %v356_v29 = vld [vmem:[#allocation5 + $0x910] sm:$0xff]  ;;  %v407_v30 = vld [vmem:[#allocation5 + $0xaa8] sm:$0xff] }
  0xba   :  { %891 = vmatpush.msrb.mxu2 %v398_v31  ;;  %910 = vmatpush.msrb.mxu3 %v449_v14  ;;  %v308_v31 = vld [vmem:[#allocation5 + $0x790] sm:$0xff] }
  0xbb   :  { %852 = vmatpush.msrb.mxu0 %v299_v32  ;;  %871 = vmatpush.msrb.mxu1 %v350_v33  ;;  %v966_v14 = vld [vmem:[#allocation2 + $0x30] sm:$0xff] }
  0xbc   :  { %892 = vmatpush.msrb.mxu2 %v395_v34  ;;  %911 = vmatpush.msrb.mxu3 %v446_v35 }
  0xbd   :  { %853 = vmatpush.msrb.mxu0 %v296_v36  ;;  %872 = vmatpush.msrb.mxu1 %v347_v37 }
  0xbe   :  { %893 = vmatpush.msrb.mxu2 %v392_v38  ;;  %912 = vmatpush.msrb.mxu3 %v443_v39 }
  0xbf   :  { %854 = vmatpush.msrb.mxu0 %v293_v40  ;;  %873 = vmatpush.msrb.mxu1 %v344_v41 }
  0xc0   :  { %894 = vmatpush.msrb.mxu2 %v389_v42  ;;  %913 = vmatpush.msrb.mxu3 %v440_v43 }
  0xc1   :  { %855 = vmatpush.msrb.mxu0 %v290_v44  ;;  %874 = vmatpush.msrb.mxu1 %v341_v45 }
  0xc2   :  { %895 = vmatpush.msrb.mxu2 %v386_v46  ;;  %914 = vmatpush.msrb.mxu3 %v437_v47 }
  0xc3   :  { %856 = vmatpush.msrb.mxu0 %v287_v48  ;;  %875 = vmatpush.msrb.mxu1 %v338_v49 }
  0xc4   :  { %896 = vmatpush.msrb.mxu2 %v383_v50  ;;  %915 = vmatpush.msrb.mxu3 %v434_v51 }
  0xc5   :  { %857 = vmatpush.msrb.mxu0 %v284_v52  ;;  %876 = vmatpush.msrb.mxu1 %v335_v53 }
  0xc6   :  { %897 = vmatpush.msrb.mxu2 %v380_v54  ;;  %916 = vmatpush.msrb.mxu3 %v431_v55 }
  0xc7   :  { %858 = vmatpush.msrb.mxu0 %v281_v56  ;;  %877 = vmatpush.msrb.mxu1 %v332_v57 }
  0xc8   :  { %898 = vmatpush.msrb.mxu2 %v377_v59  ;;  %917 = vmatpush.msrb.mxu3 %v428_v60 }
  0xc9   :  { %859 = vmatpush.msrb.mxu0 %v278_v61  ;;  %878 = vmatpush.msrb.mxu1 %v329_v62 }
  0xca   :  { %899 = vmatpush.msrb.mxu2 %v374_v1  ;;  %918 = vmatpush.msrb.mxu3 %v425_v2 }
  0xcb   :  { %860 = vmatpush.msrb.mxu0 %v275_v3  ;;  %879 = vmatpush.msrb.mxu1 %v326_v4 }
  0xcc   :  { %900 = vmatpush.msrb.mxu2 %v371_v6  ;;  %919 = vmatpush.msrb.mxu3 %v422_v7  ;;  %v467_v32 = vpop.f32.mrf.mxu0 }
  0xcd   :  { %826 = vmatmul.f32.vlgmr.msra.gmra.mxu2 %v964_v12  ;;  %861 = vmatpush.msrb.mxu0 %v272_v8 }
  0xce   :  { %880 = vmatpush.msrb.mxu1 %v323_v9  ;;  %901 = vmatpush.msrb.mxu2 %v368_v10 }
  0xcf   :  { %920 = vmatpush.msrb.mxu3 %v419_v11  ;;  %786 = vmatmul.f32.vlgmr.msra.gmra.mxu0 %v965_v16  ;;  %v487_v33 = vpop.f32.mrf.mxu1 }
  0xd0   :  { %846 = vmatmul.f32.vlgmr.msra.gmra.mxu3 %v1109_v0  ;;  %862 = vmatpush.msrb.mxu0 %v269_v13  ;;  %v311_v0 = vld [vmem:[#allocation5 + $0x7a8] sm:$0xff]  ;;  %v507_v34 = vpop.f32.mrf.mxu2  ;;  %v488_v45 = vadd.f32 %v487_v33, %v467_v32 }
  0xd1   :  { %881 = vmatpush.msrb.mxu1 %v320_v58  ;;  %902 = vmatpush.msrb.mxu2 %v365_v15  ;;  %v963_v15 = vld [vmem:[#allocation7] ss:$0 sm:$0xff] }
  0xd2   :  { %921 = vmatpush.msrb.mxu3 %v416_v17  ;;  %806 = vmatmul.f32.vlgmr.msra.gmra.mxu1 %v1112_v5  ;;  %v404_v5 = vld [vmem:[#allocation5 + $0xa90] sm:$0xff]  ;;  %v508_v48 = vadd.f32 %v507_v34, %v488_v45 }
  0xd3   :  { %863 = vmatpush.msrb.mxu0 %v266_v63  ;;  %882 = vmatpush.msrb.mxu1 %v317_v18  ;;  %v527_v35 = vpop.f32.mrf.mxu3 }
  0xd4   :  { %903 = vmatpush.msrb.mxu2 %v362_v21  ;;  %922 = vmatpush.msrb.mxu3 %v413_v22  ;;  %v528_v51 = vadd.f32 %v527_v35, %v508_v48 }
  0xd5   :  { %864 = vmatpush.msrb.mxu0 %v263_v23  ;;  %883 = vmatpush.msrb.mxu1 %v314_v24 }
  0xd6   :  { %904 = vmatpush.msrb.mxu2 %v359_v26  ;;  %923 = vmatpush.msrb.mxu3 %v410_v27  ;;  %v547_v36 = vpop.f32.mrf.mxu0 }
  0xd7   :  { %865 = vmatpush.msrb.mxu0 %v260_v28  ;;  %884 = vmatpush.msrb.mxu1 %v311_v0  ;;  %v548_v56 = vadd.f32 %v547_v36, %v528_v51 }
  0xd8   :  { %905 = vmatpush.msrb.mxu2 %v356_v29  ;;  %924 = vmatpush.msrb.mxu3 %v407_v30 }
  0xd9   :  { %866 = vmatmul.f32.vlgmr.msrb.gmra.mxu0 %v1118_v19  ;;  %906 = vmatmul.f32.vlgmr.msrb.gmra.mxu2 %v966_v14  ;;  %v567_v37 = vpop.f32.mrf.mxu1 }
  0xda   :  { %885 = vmatpush.msrb.mxu1 %v308_v31  ;;  %925 = vmatpush.msrb.mxu3 %v404_v5  ;;  %v587_v38 = vpop.f32.mrf.mxu2  ;;  %v568_v62 = vadd.f32 %v567_v37, %v548_v56 }
  0xdb   :  { %886 = vmatmul.f32.vlgmr.msrb.gmra.mxu1 %v1124_v25  ;;  %926 = vmatmul.f32.vlgmr.msrb.gmra.mxu3 %v1121_v20 }
  0xdc   :  { %v588_v6 = vadd.f32 %v587_v38, %v568_v62 }
  0xdd   :  { %v607_v39 = vpop.f32.mrf.mxu3 }
  0xde   :  { %v608_v10 = vadd.f32 %v607_v39, %v588_v6 }
 0x10a   :  { %v627_v40 = vpop.f32.mrf.mxu0 }
 0x10d   :  { %v647_v41 = vpop.f32.mrf.mxu1 }
 0x10e   :  { %v667_v42 = vpop.f32.mrf.mxu2  ;;  %v648_v43 = vadd.f32 %v647_v41, %v627_v40 }
 0x110   :  { %v668_v46 = vadd.f32 %v667_v42, %v648_v43 }
 0x111   :  { %v687_v19 = vpop.f32.mrf.mxu3 }
 0x112   :  { %v688_v20 = vadd.f32 %v687_v19, %v668_v46 }
 0x114   :  { %v707_v44 = vpop.f32.mrf.mxu0 }
 0x115   :  { %v708_v52 = vadd.f32 %v707_v44, %v688_v20 }
 0x117   :  { %v727_v47 = vpop.f32.mrf.mxu1 }
 0x118   :  { %v747_v25 = vpop.f32.mrf.mxu2  ;;  %v728_v59 = vadd.f32 %v727_v47, %v708_v52 }
 0x11a   :  { %v748_v2 = vadd.f32 %v747_v25, %v728_v59 }
 0x11b   :  { %v767_v49 = vpop.f32.mrf.mxu3 }
 0x11c   :  { %v768_v7 = vadd.f32 %v767_v49, %v748_v2 }
 0x11e   :  { %v930_v13 = vadd.f32 %v768_v7, %v608_v10 }
 0x14c   :  { %v787_v50 = vpop.f32.mrf.mxu0 }
 0x14f   :  { %v807_v53 = vpop.f32.mrf.mxu1 }
 0x150   :  { %v808_v54 = vadd.f32 %v807_v53, %v787_v50  ;;  %v827_v55 = vpop.f32.mrf.mxu2 }
 0x152   :  { %v828_v57 = vadd.f32 %v827_v55, %v808_v54 }
 0x153   :  { %v847_v60 = vpop.f32.mrf.mxu3 }
 0x154   :  { %v848_v61 = vadd.f32 %v847_v60, %v828_v57 }
 0x156   :  { %v867_v1 = vpop.f32.mrf.mxu0 }
 0x157   :  { %v868_v3 = vadd.f32 %v867_v1, %v848_v61 }
 0x158   :  { %v887_v4 = vpop.f32.mrf.mxu1 }
 0x159   :  { %v888_v8 = vadd.f32 %v887_v4, %v868_v3 }
 0x15c   :  { %v907_v9 = vpop.f32.mrf.mxu2 }
 0x15d   :  { %v908_v11 = vadd.f32 %v907_v9, %v888_v8 }
 0x15e   :  { %v927_v12 = vpop.f32.mrf.mxu3 }
 0x15f   :  { %v928_v58 = vadd.f32 %v927_v12, %v908_v11 }
 0x161   :  { %v931_v16 = vadd.f32 %v930_v13, %v928_v58 }
 0x163   :  { %v936_v17 = vadd.f32 %v963_v15, %v931_v16 }
 0x165   :  { %v937_v63 = vmul.f32 0.33333334, %v936_v17 }
 0x167   :  { %938 = vst [vmem:[#allocation8] sm:$0xff] %v937_v63 }
 0x168   :  { %949 = dma.vmem_to_hbm [thread:$0]  %s945_s2, 128, %s947_s30, [#allocation4]  }
 0x169   :  { %1067 = dma.done.wait [#allocation4], 128  }
 0x16a   :  { %1068 = vsyncadd [#allocation4], 4294967168 }
 0x16b   :  { %954 = vsyncpa [#allocation3], 1 }
 0x16c   :  { %955 = vsyncpa [#allocation6], 1 }
 0x16d   :  { %956 = vsyncpa [#allocation4], 1 }

</bundles_post_ra>
